<compile_context>
chip_gen: v5e
topology: v5e:2x2
jax: 0.10.0
libtpu: 0.0.40
codegen_flags: <defaults>
</compile_context>

<pallas_src>
import functools

import jax
import jax.numpy as jnp
from jax import lax
from jax.experimental import pallas as pl
from jax.experimental.pallas import tpu as pltpu


def _cdiv(a, b):
    return (a + b - 1) // b


def _round_up(x, m):
    return _cdiv(x, m) * m


def _round_down(x, m):
    return (x // m) * m


def _pick_tile_target_bytes():
    """Combined (input+output) bytes to move per grid step.

    Generation-aware: ~10-12 MiB per step (double-buffered => 20-24 MiB working
    set).  That is under the v6e/v7x scoped-VMEM defaults; when the estimate
    exceeds 14 MiB we explicitly raise vmem_limit_bytes (needed on v5e).
    """
    cap = 64 * 1024 * 1024  # conservative fallback (v7x per-core VMEM)
    try:
        cap = int(pltpu.get_tpu_info().vmem_capacity_bytes)
    except Exception:
        pass
    budget = max(8 * 1024 * 1024, min(28 * 1024 * 1024, cap // 3))
    return max(512 * 1024, min(12 * 1024 * 1024, budget // 2))


def _compiler_params(vmem_need_bytes):
    kw = dict(dimension_semantics=("parallel", "parallel"))
    if vmem_need_bytes > 14 * 1024 * 1024:
        # Raise the scoped-VMEM limit (v5e default is 16 MiB); harmless elsewhere.
        kw["vmem_limit_bytes"] = int(
            min(vmem_need_bytes * 5 // 4 + 2 * 1024 * 1024, 34 * 1024 * 1024))
    return pltpu.CompilerParams(**kw)


# ---------------------------------------------------------------------------
# Tiny-channel path: VPU broadcast-FMAs over sublane+lane-dense pixel slabs.
# ---------------------------------------------------------------------------

def _pick_chunk(st, c_in):
    # Sublane chunk for the inner loop: bounds the accumulator + per-channel
    # operands to a handful of vregs even for multi-MB tiles.
    cap = 32 if c_in <= 4 else 16
    for c in (32, 16, 8):
        if c <= cap and st % c == 0:
            return c
    return st


def _plan_tiny_tiles(N, S, c_in, c_out, itemsize, tile_target):
    """Pick (batch block bn, sublane block st, inner chunk) for the VPU path."""
    row_bytes = (c_in + c_out) * 128 * itemsize          # one 128-pixel row, in+out
    if S <= 32:
        # Small image: take the whole image and block many images per step.
        st = S
        per_img = max(1, S * row_bytes)
        bn = max(1, min(N, tile_target // per_img))
    else:
        # Large image: one image per step, big sublane tile (multiple of 8).
        bn = 1
        st = min(_round_down(S, 32),
                 max(32, _round_down(tile_target // row_bytes, 32)))
    # Keep at least 2 grid steps when the problem allows it (v7x megacore).
    if _cdiv(N, bn) * _cdiv(S, st) < 2:
        if N >= 2:
            bn = (N + 1) // 2
        elif S >= 16:
            st = _round_up(_cdiv(S, 2), 8)
    return bn, st, _pick_chunk(st, c_in)


def _outconv_vpu_kernel(x_ref, w_ref, b_ref, o_ref, *, chunk):
    # x_ref: (bn, C_in, st, 128) VMEM  -- pixels dense on sublane AND lane.
    # w_ref: (C_out, C_in) f32 SMEM, b_ref: (C_out,) f32 SMEM.
    # o_ref: (bn, C_out, st, 128) VMEM.
    bn, c_in, st, _ = x_ref.shape
    c_out = o_ref.shape[1]
    n_chunks = st // chunk

    # Hoist the (tiny) scalar weight/bias reads out of the pixel loops.
    w = [[w_ref[co, ci] for ci in range(c_in)] for co in range(c_out)]
    b = [b_ref[co] for co in range(c_out)]

    def process(it):
        if n_chunks > 1:
            bi = it // n_chunks
            ck = it % n_chunks
        else:
            bi, ck = it, 0
        s0 = ck * chunk
        if not isinstance(s0, int):
            s0 = pl.multiple_of(s0, chunk)
        sl = pl.ds(s0, chunk)
        # Load each input-channel slab once; reuse across all output channels.
        xs = [x_ref[bi, ci, sl, :].astype(jnp.float32) for ci in range(c_in)]
        for co in range(c_out):
            acc = jnp.full((chunk, 128), b[co], dtype=jnp.float32)
            for ci in range(c_in):
                acc = acc + xs[ci] * w[co][ci]
            o_ref[bi, co, sl, :] = acc.astype(o_ref.dtype)

    total = bn * n_chunks
    if total <= 8:
        for it in range(total):          # fully static: cheapest codegen
            process(it)
    else:
        def body(it, carry):
            process(it)
            return carry
        lax.fori_loop(0, total, body, 0)


def _outconv_tiny(x_nchw, w2, bias, tile_target):
    N, C_in, H, W = x_nchw.shape
    C_out = w2.shape[0]
    HW = H * W
    itemsize = x_nchw.dtype.itemsize

    HWp = _round_up(HW, 128)
    x3 = x_nchw.reshape(N, C_in, HW)
    if HWp != HW:
        # TODO(synk): padding costs one extra pass over x; only taken when the
        # spatial size is not a multiple of 128.
        x3 = jnp.pad(x3, ((0, 0), (0, 0), (0, HWp - HW)))
    S = HWp // 128
    x4 = x3.reshape(N, C_in, S, 128)     # free, row-major reshape

    bn, st, chunk = _plan_tiny_tiles(N, S, C_in, C_out, itemsize, tile_target)
    grid = (_cdiv(N, bn), _cdiv(S, st))

    wf = w2.astype(jnp.float32)
    bf = bias.astype(jnp.float32)

    vmem_need = 2 * bn * (C_in + C_out) * st * 128 * itemsize + 256 * 1024
    flops = 2 * N * HW * C_in * C_out
    bytes_accessed = N * (C_in + C_out) * HWp * itemsize + (wf.size + bf.size) * 4

    out4 = pl.pallas_call(
        functools.partial(_outconv_vpu_kernel, chunk=chunk),
        out_shape=jax.ShapeDtypeStruct((N, C_out, S, 128), x_nchw.dtype),
        grid_spec=pltpu.PrefetchScalarGridSpec(
            num_scalar_prefetch=0,
            grid=grid,
            in_specs=[
                pl.BlockSpec((bn, C_in, st, 128), lambda nb, sb: (nb, 0, sb, 0)),
                pl.BlockSpec(memory_space=pltpu.MemorySpace.SMEM),   # weight
                pl.BlockSpec(memory_space=pltpu.MemorySpace.SMEM),   # bias
            ],
            out_specs=pl.BlockSpec((bn, C_out, st, 128),
                                   lambda nb, sb: (nb, 0, sb, 0)),
        ),
        compiler_params=_compiler_params(vmem_need),
        cost_estimate=pl.CostEstimate(flops=flops, transcendentals=0,
                                      bytes_accessed=bytes_accessed),
    )(x4, wf, bf)

    out3 = out4.reshape(N, C_out, HWp)
    if HWp != HW:
        out3 = out3[:, :, :HW]
    return out3.reshape(N, C_out, H, W)


# ---------------------------------------------------------------------------
# Larger-channel path: MXU matmul over lane-dense pixel tiles.
# ---------------------------------------------------------------------------

def _plan_mxu_tp(N, HW, c_in, c_out, itemsize, tile_target, w_bytes):
    per_px = (c_in + c_out) * itemsize
    eff = max(256 * 1024, tile_target - 2 * w_bytes)   # weight is double-buffered
    tp = max(128, _round_down(eff // per_px, 128))
    if tp >= HW:
        tp = HW
        if N == 1 and HW >= 256:
            tp = _round_up(_cdiv(HW, 2), 128)          # >= 2 tiles for megacore
    return tp


def _outconv_mxu_kernel(x_ref, w_ref, b_ref, o_ref, *, precision):
    # x_ref: (C_in, tp), w_ref: (C_out, C_in), b_ref: (C_out, 1) f32, o_ref: (C_out, tp)
    acc = jnp.dot(w_ref[...], x_ref[...],
                  preferred_element_type=jnp.float32, precision=precision)
    o_ref[...] = (acc + b_ref[...]).astype(o_ref.dtype)


def _outconv_mxu(x_nchw, w2, bias, tile_target):
    N, C_in, H, W = x_nchw.shape
    C_out = w2.shape[0]
    HW = H * W
    itemsize = x_nchw.dtype.itemsize

    x3 = x_nchw.reshape(N, C_in, HW)
    wk = w2.astype(x_nchw.dtype)
    bk = bias.astype(jnp.float32).reshape(C_out, 1)
    w_bytes = int(wk.size) * wk.dtype.itemsize

    tp = _plan_mxu_tp(N, HW, C_in, C_out, itemsize, tile_target, w_bytes)
    grid = (N, _cdiv(HW, tp))

    # f32 inputs: full-precision MXU passes so we match a float32 reference.
    precision = (lax.Precision.HIGHEST if x_nchw.dtype == jnp.float32
                 else lax.Precision.DEFAULT)

    vmem_need = (2 * (C_in + C_out) * tp * itemsize + 2 * w_bytes
                 + 2 * C_out * 4 + 256 * 1024)
    flops = 2 * N * HW * C_in * C_out
    bytes_accessed = N * (C_in + C_out) * HW * itemsize + w_bytes + C_out * 4

    out3 = pl.pallas_call(
        functools.partial(_outconv_mxu_kernel, precision=precision),
        out_shape=jax.ShapeDtypeStruct((N, C_out, HW), x_nchw.dtype),
        grid_spec=pltpu.PrefetchScalarGridSpec(
            num_scalar_prefetch=0,
            grid=grid,
            in_specs=[
                pl.BlockSpec((None, C_in, tp), lambda n, p: (n, 0, p)),
                pl.BlockSpec((C_out, C_in), lambda n, p: (0, 0)),    # weight
                pl.BlockSpec((C_out, 1), lambda n, p: (0, 0)),       # bias
            ],
            out_specs=pl.BlockSpec((None, C_out, tp), lambda n, p: (n, 0, p)),
        ),
        compiler_params=_compiler_params(vmem_need),
        cost_estimate=pl.CostEstimate(flops=flops, transcendentals=0,
                                      bytes_accessed=bytes_accessed),
    )(x3, wk, bk)
    return out3.reshape(N, C_out, H, W)


def outconv_forward(x_nchw, weight, bias):
    """Forward of outconv: nn.Conv2d(in_ch, out_ch, kernel_size=1).

    x_nchw: (N, C_in, H, W); weight: (C_out, C_in, 1, 1); bias: (C_out,).
    Returns (N, C_out, H, W) in x's dtype.
    """
    C_out, C_in = weight.shape[0], weight.shape[1]
    assert x_nchw.shape[1] == C_in
    w2 = weight[:, :, 0, 0]
    tile_target = _pick_tile_target_bytes()
    if C_in <= 8 and C_out <= 8:
        return _outconv_tiny(x_nchw, w2, bias, tile_target)
    return _outconv_mxu(x_nchw, w2, bias, tile_target)


if __name__ == "__main__":
    # Shapes consistent with the module: batch=2, in_ch=4, out_ch=3, spatial=16.
    N, C_in, C_out, H, W = 2, 4, 3, 16, 16
    kx, kw, kb = jax.random.split(jax.random.PRNGKey(0), 3)
    x = jax.random.normal(kx, (N, C_in, H, W), dtype=jnp.float32)
    weight = jax.random.normal(kw, (C_out, C_in, 1, 1), dtype=jnp.float32) * 0.1
    bias = jax.random.normal(kb, (C_out,), dtype=jnp.float32) * 0.1

    out = jax.block_until_ready(outconv_forward(x, weight, bias))
    ref = (jnp.einsum("nchw,oc->nohw", x, weight[:, :, 0, 0],
                      precision=lax.Precision.HIGHEST)
           + bias[None, :, None, None])
    assert out.shape == (N, C_out, H, W)
    assert jnp.allclose(out, ref, atol=1e-5, rtol=1e-5), \
        float(jnp.max(jnp.abs(out - ref)))

    # Also exercise the larger-channel (MXU) path once.
    kx2, kw2, kb2 = jax.random.split(jax.random.PRNGKey(1), 3)
    x2 = jax.random.normal(kx2, (1, 32, 8, 8), dtype=jnp.float32)
    weight2 = jax.random.normal(kw2, (16, 32, 1, 1), dtype=jnp.float32) * 0.1
    bias2 = jax.random.normal(kb2, (16,), dtype=jnp.float32) * 0.1
    out2 = jax.block_until_ready(outconv_forward(x2, weight2, bias2))
    ref2 = (jnp.einsum("nchw,oc->nohw", x2, weight2[:, :, 0, 0],
                       precision=lax.Precision.HIGHEST)
            + bias2[None, :, None, None])
    assert jnp.allclose(out2, ref2, atol=1e-4, rtol=1e-4), \
        float(jnp.max(jnp.abs(out2 - ref2)))

    print("KERNEL_OK")
</pallas_src>

<mosaic_0001>
module attributes {stable_mosaic.version = 11 : i64} {
  func.func @_outconv_vpu_kernel(%arg0: i32, %arg1: i32, %arg2: memref<1x4x2x128xf32, #tpu.memory_space<vmem>>, %arg3: memref<3x4xf32, #tpu.memory_space<smem>>, %arg4: memref<3xf32, #tpu.memory_space<smem>>, %arg5: memref<1x3x2x128xf32, #tpu.memory_space<vmem>>) attributes {dimension_semantics = [#tpu.dimension_semantics<parallel>, #tpu.dimension_semantics<parallel>], iteration_bounds = array<i64: 2, 1>, scalar_prefetch = 0 : i64, scratch_operands = 0 : i64, tpu.core_type = #tpu.core_type<tc>, window_params = [{transform_indices = @transform_0, window_bounds = array<i64: 1, 4, 2, 128>}, {transform_indices = @transform_1, window_bounds = array<i64: 3, 4>}, {transform_indices = @transform_2, window_bounds = array<i64: 3>}, {transform_indices = @transform_3, window_bounds = array<i64: 1, 3, 2, 128>}]} {
    %c0 = arith.constant 0 : index
    %c0_0 = arith.constant 0 : index
    %0 = memref.load %arg3[%c0, %c0_0] : memref<3x4xf32, #tpu.memory_space<smem>>
    %c0_1 = arith.constant 0 : index
    %c1 = arith.constant 1 : index
    %1 = memref.load %arg3[%c0_1, %c1] : memref<3x4xf32, #tpu.memory_space<smem>>
    %c0_2 = arith.constant 0 : index
    %c2 = arith.constant 2 : index
    %2 = memref.load %arg3[%c0_2, %c2] : memref<3x4xf32, #tpu.memory_space<smem>>
    %c0_3 = arith.constant 0 : index
    %c3 = arith.constant 3 : index
    %3 = memref.load %arg3[%c0_3, %c3] : memref<3x4xf32, #tpu.memory_space<smem>>
    %c1_4 = arith.constant 1 : index
    %c0_5 = arith.constant 0 : index
    %4 = memref.load %arg3[%c1_4, %c0_5] : memref<3x4xf32, #tpu.memory_space<smem>>
    %c1_6 = arith.constant 1 : index
    %c1_7 = arith.constant 1 : index
    %5 = memref.load %arg3[%c1_6, %c1_7] : memref<3x4xf32, #tpu.memory_space<smem>>
    %c1_8 = arith.constant 1 : index
    %c2_9 = arith.constant 2 : index
    %6 = memref.load %arg3[%c1_8, %c2_9] : memref<3x4xf32, #tpu.memory_space<smem>>
    %c1_10 = arith.constant 1 : index
    %c3_11 = arith.constant 3 : index
    %7 = memref.load %arg3[%c1_10, %c3_11] : memref<3x4xf32, #tpu.memory_space<smem>>
    %c2_12 = arith.constant 2 : index
    %c0_13 = arith.constant 0 : index
    %8 = memref.load %arg3[%c2_12, %c0_13] : memref<3x4xf32, #tpu.memory_space<smem>>
    %c2_14 = arith.constant 2 : index
    %c1_15 = arith.constant 1 : index
    %9 = memref.load %arg3[%c2_14, %c1_15] : memref<3x4xf32, #tpu.memory_space<smem>>
    %c2_16 = arith.constant 2 : index
    %c2_17 = arith.constant 2 : index
    %10 = memref.load %arg3[%c2_16, %c2_17] : memref<3x4xf32, #tpu.memory_space<smem>>
    %c2_18 = arith.constant 2 : index
    %c3_19 = arith.constant 3 : index
    %11 = memref.load %arg3[%c2_18, %c3_19] : memref<3x4xf32, #tpu.memory_space<smem>>
    %c0_20 = arith.constant 0 : index
    %12 = memref.load %arg4[%c0_20] : memref<3xf32, #tpu.memory_space<smem>>
    %c1_21 = arith.constant 1 : index
    %13 = memref.load %arg4[%c1_21] : memref<3xf32, #tpu.memory_space<smem>>
    %c2_22 = arith.constant 2 : index
    %14 = memref.load %arg4[%c2_22] : memref<3xf32, #tpu.memory_space<smem>>
    %c0_23 = arith.constant 0 : index
    %c0_24 = arith.constant 0 : index
    %c0_25 = arith.constant 0 : index
    %c0_26 = arith.constant 0 : index
    %15 = vector.load %arg2[%c0_23, %c0_24, %c0_25, %c0_26] : memref<1x4x2x128xf32, #tpu.memory_space<vmem>>, vector<1x1x2x128xf32>
    %16 = vector.shape_cast %15 : vector<1x1x2x128xf32> to vector<2x128xf32>
    %c0_27 = arith.constant 0 : index
    %c1_28 = arith.constant 1 : index
    %c0_29 = arith.constant 0 : index
    %c0_30 = arith.constant 0 : index
    %17 = vector.load %arg2[%c0_27, %c1_28, %c0_29, %c0_30] : memref<1x4x2x128xf32, #tpu.memory_space<vmem>>, vector<1x1x2x128xf32>
    %18 = vector.shape_cast %17 : vector<1x1x2x128xf32> to vector<2x128xf32>
    %c0_31 = arith.constant 0 : index
    %c2_32 = arith.constant 2 : index
    %c0_33 = arith.constant 0 : index
    %c0_34 = arith.constant 0 : index
    %19 = vector.load %arg2[%c0_31, %c2_32, %c0_33, %c0_34] : memref<1x4x2x128xf32, #tpu.memory_space<vmem>>, vector<1x1x2x128xf32>
    %20 = vector.shape_cast %19 : vector<1x1x2x128xf32> to vector<2x128xf32>
    %c0_35 = arith.constant 0 : index
    %c3_36 = arith.constant 3 : index
    %c0_37 = arith.constant 0 : index
    %c0_38 = arith.constant 0 : index
    %21 = vector.load %arg2[%c0_35, %c3_36, %c0_37, %c0_38] : memref<1x4x2x128xf32, #tpu.memory_space<vmem>>, vector<1x1x2x128xf32>
    %22 = vector.shape_cast %21 : vector<1x1x2x128xf32> to vector<2x128xf32>
    %23 = vector.broadcast %12 : f32 to vector<2x128xf32>
    %24 = vector.broadcast %0 : f32 to vector<2x128xf32>
    %25 = arith.mulf %16, %24 : vector<2x128xf32>
    %26 = arith.addf %23, %25 : vector<2x128xf32>
    %27 = vector.broadcast %1 : f32 to vector<2x128xf32>
    %28 = arith.mulf %18, %27 : vector<2x128xf32>
    %29 = arith.addf %26, %28 : vector<2x128xf32>
    %30 = vector.broadcast %2 : f32 to vector<2x128xf32>
    %31 = arith.mulf %20, %30 : vector<2x128xf32>
    %32 = arith.addf %29, %31 : vector<2x128xf32>
    %33 = vector.broadcast %3 : f32 to vector<2x128xf32>
    %34 = arith.mulf %22, %33 : vector<2x128xf32>
    %35 = arith.addf %32, %34 : vector<2x128xf32>
    %c0_39 = arith.constant 0 : index
    %c0_40 = arith.constant 0 : index
    %c0_41 = arith.constant 0 : index
    %c0_42 = arith.constant 0 : index
    %36 = vector.load %arg5[%c0_39, %c0_40, %c0_41, %c0_42] : memref<1x3x2x128xf32, #tpu.memory_space<vmem>>, vector<1x1x2x128xf32>
    %37 = vector.shape_cast %36 : vector<1x1x2x128xf32> to vector<2x128xf32>
    %38 = vector.shape_cast %35 : vector<2x128xf32> to vector<1x1x2x128xf32>
    tpu.vector_store %arg5[%c0_39, %c0_40, %c0_41, %c0_42], %38 {strides = array<i32>} : memref<1x3x2x128xf32, #tpu.memory_space<vmem>>, vector<1x1x2x128xf32>,
    %39 = vector.broadcast %13 : f32 to vector<2x128xf32>
    %40 = vector.broadcast %4 : f32 to vector<2x128xf32>
    %41 = arith.mulf %16, %40 : vector<2x128xf32>
    %42 = arith.addf %39, %41 : vector<2x128xf32>
    %43 = vector.broadcast %5 : f32 to vector<2x128xf32>
    %44 = arith.mulf %18, %43 : vector<2x128xf32>
    %45 = arith.addf %42, %44 : vector<2x128xf32>
    %46 = vector.broadcast %6 : f32 to vector<2x128xf32>
    %47 = arith.mulf %20, %46 : vector<2x128xf32>
    %48 = arith.addf %45, %47 : vector<2x128xf32>
    %49 = vector.broadcast %7 : f32 to vector<2x128xf32>
    %50 = arith.mulf %22, %49 : vector<2x128xf32>
    %51 = arith.addf %48, %50 : vector<2x128xf32>
    %c0_43 = arith.constant 0 : index
    %c1_44 = arith.constant 1 : index
    %c0_45 = arith.constant 0 : index
    %c0_46 = arith.constant 0 : index
    %52 = vector.load %arg5[%c0_43, %c1_44, %c0_45, %c0_46] : memref<1x3x2x128xf32, #tpu.memory_space<vmem>>, vector<1x1x2x128xf32>
    %53 = vector.shape_cast %52 : vector<1x1x2x128xf32> to vector<2x128xf32>
    %54 = vector.shape_cast %51 : vector<2x128xf32> to vector<1x1x2x128xf32>
    tpu.vector_store %arg5[%c0_43, %c1_44, %c0_45, %c0_46], %54 {strides = array<i32>} : memref<1x3x2x128xf32, #tpu.memory_space<vmem>>, vector<1x1x2x128xf32>,
    %55 = vector.broadcast %14 : f32 to vector<2x128xf32>
    %56 = vector.broadcast %8 : f32 to vector<2x128xf32>
    %57 = arith.mulf %16, %56 : vector<2x128xf32>
    %58 = arith.addf %55, %57 : vector<2x128xf32>
    %59 = vector.broadcast %9 : f32 to vector<2x128xf32>
    %60 = arith.mulf %18, %59 : vector<2x128xf32>
    %61 = arith.addf %58, %60 : vector<2x128xf32>
    %62 = vector.broadcast %10 : f32 to vector<2x128xf32>
    %63 = arith.mulf %20, %62 : vector<2x128xf32>
    %64 = arith.addf %61, %63 : vector<2x128xf32>
    %65 = vector.broadcast %11 : f32 to vector<2x128xf32>
    %66 = arith.mulf %22, %65 : vector<2x128xf32>
    %67 = arith.addf %64, %66 : vector<2x128xf32>
    %c0_47 = arith.constant 0 : index
    %c2_48 = arith.constant 2 : index
    %c0_49 = arith.constant 0 : index
    %c0_50 = arith.constant 0 : index
    %68 = vector.load %arg5[%c0_47, %c2_48, %c0_49, %c0_50] : memref<1x3x2x128xf32, #tpu.memory_space<vmem>>, vector<1x1x2x128xf32>
    %69 = vector.shape_cast %68 : vector<1x1x2x128xf32> to vector<2x128xf32>
    %70 = vector.shape_cast %67 : vector<2x128xf32> to vector<1x1x2x128xf32>
    tpu.vector_store %arg5[%c0_47, %c2_48, %c0_49, %c0_50], %70 {strides = array<i32>} : memref<1x3x2x128xf32, #tpu.memory_space<vmem>>, vector<1x1x2x128xf32>,
    return
  }
  func.func @transform_0(%arg0: i32, %arg1: i32) -> (i32, i32, i32, i32) {
    %c0_i32 = arith.constant 0 : i32
    %c0_i32_0 = arith.constant 0 : i32
    %c0_i32_1 = arith.constant 0 : i32
    return %arg0, %c0_i32, %arg1, %c0_i32_0 : i32, i32, i32, i32
  }
  func.func @transform_1(%arg0: i32, %arg1: i32) -> (i32, i32) {
    %c0_i32 = arith.constant 0 : i32
    %c0_i32_0 = arith.constant 0 : i32
    %c0_i32_1 = arith.constant 0 : i32
    return %c0_i32, %c0_i32_0 : i32, i32
  }
  func.func @transform_2(%arg0: i32, %arg1: i32) -> i32 {
    %c0_i32 = arith.constant 0 : i32
    %c0_i32_0 = arith.constant 0 : i32
    return %c0_i32 : i32
  }
  func.func @transform_3(%arg0: i32, %arg1: i32) -> (i32, i32, i32, i32) {
    %c0_i32 = arith.constant 0 : i32
    %c0_i32_0 = arith.constant 0 : i32
    %c0_i32_1 = arith.constant 0 : i32
    return %arg0, %c0_i32, %arg1, %c0_i32_0 : i32, i32, i32, i32
  }
}

</mosaic_0001>

<bundles_post_ra>
// kernel: tpu_custom_call.1
= control target key start
LH: loop header
LB: loop body
LE: loop exit
PB: predicated region body
PF: predicated region fallthrough
CT: control target
= control target key end

     0   :  { %s891_s0 = inlined_call_operand.hbm [shape: f32[2,4,2,128], index: 0, kind: input, shape index: {}]   ;;  %s892_s1 = inlined_call_operand.hbm [shape: f32[3,4], index: 1, kind: input, shape index: {}]   ;;  %s893_s2 = inlined_call_operand.vmem [shape: f32[3], index: 2, kind: input, shape index: {}]   ;;  %s894_s3 = inlined_call_operand.hbm [shape: f32[2,3,2,128], index: 3, kind: output, shape index: {}]  }
   0x1   :  { %895 = sst [smem:[#allocation14_spill]] %s892_s1 }
   0x2   :  { %8 = vsyncpa [#allocation3], 0 }
   0x3   :  { %10 = vsyncpa [#allocation3 + $0x1], 0 }
   0x4   :  { %11 = vsyncpa [#allocation5], 0 }
   0x5   :  { %12 = vsyncpa [#allocation6], 0 }
   0x6   :  { %13 = vsyncpa [#allocation4], 0 }
   0x7   :  { %15 = vsyncpa [#allocation4 + $0x1], 0  ;;  %s729_s12 = smov 0   ;;  %s731_s13 = smov 0  }
   0x8   :  { %s733_s14 = smov 0   ;;  %s735_s15 = smov 0  }
   0x9   :  { %s737_s16 = smov 0   ;;  %s739_s17 = smov 0  }
   0xa LB: > { %s427_s18 = sadd.s32 4294967295, %s701_s17   ;;  %s428_s19 = sadd.s32 4294967294, %s701_s17   ;;  %s701_s17 = sphi %s739_s17, %s21_s17   ;;  %s697_s16 = sphi %s737_s16, %s908_s16   ;;  %s693_s15 = sphi %s735_s15, %s907_s15   ;;  %s689_s14 = sphi %s733_s14, %s906_s14   ;;  %s685_s13 = sphi %s731_s13, %s905_s13   ;;  %s681_s12 = sphi %s729_s12, %s904_s12  }
   0xb   : > { %s42_s20 = sadd.s32 1, %s689_s14  ;;  %p49_p0 = scmp.ne.s32.totalorder %s689_s14, %s685_s13 }
   0xc   : > { %p50_p1 = scmp.eq.s32.totalorder %s701_s17, 0  ;;  %p55_p2 = scmp.ne.s32.totalorder %s685_s13, %s681_s12 }
   0xd   : > { %p767_p3 = scmp.eq.s32.totalorder %s427_s18, 0  ;;  %p123_p4 = scmp.eq.s32.totalorder %s427_s18, 1 }
   0xe   : > { %p771_p5 = por %p50_p1, %p49_p0  ;;  %p129_p6 = scmp.eq.s32.totalorder %s428_s19, 1 }
   0xf   : > { %p777_p7 = por %p767_p3, %p55_p2  ;;  %p781_p8 = por %p123_p4, %p49_p0 }
  0x10   : > { %p785_p9 = por %p129_p6, %p55_p2  ;;  %p429_p10 = scmp.ge.s32.totalorder %s701_s17, 1 }
  0x11   : > { %p136_p11 = scmp.lt.s32.totalorder %s701_s17, 3  ;;  %s901_s1 = sld [smem:[#allocation14_spill]] }
  0x12   : > { %p432_p13 = scmp.ge.s32.totalorder %s701_s17, 2  ;;  %p493_p0 = scmp.lt.s32.totalorder %s701_s17, 2 }
  0x13   : > { %p794_p12 = pnand %p429_p10, %p136_p11  ;;  %s158_s5 = sshll.u32 %s893_s2, 4  ;;  %s159_s5 = int_to_ptr.vmem [resolvable:$true] %s158_s5 }
  0x14   : > { %p807_p2 = pnand %p493_p0, %p771_p5  ;;  %s703_s7 = smov [#allocation7]  }
  0x15   : > { %p476_p1 = pneg %p794_p12  ;;  %s704_s8 = smov [#allocation8]  }
  0x16   : > { %s33_s9 = sadd.s32 1, %s697_s16  ;;  %s169_s10 = sand.u32 1, %s689_s14  }
  0x17   : > { %s148_s28 = sshll.u32 %s901_s1, 4  ;;  %p477_p4 = pnand %p476_p1, %p767_p3  ;;  %s149_s28 = int_to_ptr.hbm [resolvable:$true] %s148_s28 }
  0x18   : > { %p35_p6 = scmp.ge.s32.totalorder %s33_s9, 2  ;;  %s433_s11 = sshll.u32 %s169_s10, 3 }
  0x19   : > { %479 = dma.hbm_to_smem (!%p477_p4), %s149_s28, 64, %s703_s7, [#allocation5]  }
  0x1a   : > { %482 = dma.vmem_to_smem (!%p477_p4), %s159_s5, 16, %s704_s8, [#allocation6]  }
  0x1b   : > { %s461_s18 = sshll.u32 %s697_s16, 3  ;;  %s910_s9 = smov (%p35_p6, %s33_s9), 0 }
  0x1c   : > { %s179_s26 = scalar_lea.hbm %s891_s0, %s461_s18  ;;  %s37_s27 = ssub.s32 %s697_s16, %s910_s9 }
  0x1d   : > { %s180_s30 = sshll.u32 %s179_s26, 4  ;;  %p40_p5 = scmp.eq.s32.totalorder %s37_s27, 0  ;;  %s181_s30 = int_to_ptr.hbm [resolvable:$true] %s180_s30 }
  0x1e   : > { %s173_s28 = scalar_lea.vmem [#allocation2], %s433_s11  ;;  %s170_s7 = scalar_lea.sflag [#allocation3], %s169_s10 }
  0x1f   : > { %s182_s4 = sshll.u32 %s173_s28, 4  ;;  %s705_s8 = smov 32   ;;  %s183_s4 = int_to_ptr.vmem [resolvable:$true] %s182_s4 }
  0x20   : > { %s826_s5 = scalar_select %p40_p5, %s689_s14, %s42_s20  }
  0x21   : > { %s706_s1 = smov 2   ;;  %194 = sbr.rel (%p794_p12) target bundleno = 78 (0x4e), region = 32 }
  0x22   : > { %486 = dma.hbm_to_vmem [thread:$0]  (!%p807_p2), %s181_s30, 128, %s183_s4, %s170_s7, %s705_s8, %s705_s8, %s706_s1  }
  0x23   : > { %s833_s18 = sand.u32 (!%p794_p12), 1, %s685_s13  }
  0x24   : > { %s437_s11 = sshll.u32 (!%p794_p12), %s833_s18, 3  ;;  %s197_s19 = scalar_lea.sflag (!%p794_p12), [#allocation3], %s833_s18 }
  0x25   : > { %s200_s22 = scalar_lea.vmem (!%p794_p12), [#allocation2], %s437_s11 }
  0x26   : > { %664 = dma.done.wait (%p777_p7), %s197_s19, 128  }
  0x27   : > { %666 = vsyncadd (%p777_p7), %s197_s19, 4294967168 }
  0x28   : > { %668 = dma.done.wait (%p767_p3), [#allocation5], 64  }
  0x29   : > { %670 = vsyncadd (%p767_p3), [#allocation5], 4294967232 }
  0x2a   : > { %672 = dma.done.wait (%p767_p3), [#allocation6], 16  }
  0x2b   : > { %674 = vsyncadd (%p767_p3), [#allocation6], 4294967280 }
  0x2c   : > { %216 = sfence }
  0x2d   : > { %s235_s1 = sld [smem:[#allocation7]]  ;;  %v250_v0 = vld [vmem:[%s200_s22] sm:$0x3]  ;;  %v453_v1 = vld [vmem:[%s200_s22 + $0x2] sm:$0x3]  ;;  %s462_s7 = smul.u32 6, %s833_s18 }
  0x2e   : > { %s440_s20 = sld [smem:[#allocation7 + $0x1]]  ;;  %v454_v5 = vld [vmem:[%s200_s22 + $0x4] sm:$0x3]  ;;  %v455_v8 = vld [vmem:[%s200_s22 + $0x6] sm:$0x3]  ;;  %s463_s22 = smul.u32 6, %s693_s15 }
  0x2f   : > { %s441_s29 = sld [smem:[#allocation7 + $0x2]] }
  0x30   : > { %s442_s6 = sld [smem:[#allocation7 + $0x3]] }
  0x31   : > { %s247_s10 = sld [smem:[#allocation8]] }
  0x32   : > { %s443_s23 = sld [smem:[#allocation7 + $0x80]] }
  0x33   : > { %v258_v2 = vstv %s235_s1  ;;  %s444_s26 = sld [smem:[#allocation7 + $0x81]]  ;;  %s234_s1 = scalar_lea.vmem [#allocation9], %s462_s7 }
  0x34   : > { %v259_v3 = vmul.f32 %v258_v2, %v250_v0  ;;  %v261_v4 = vstv %s440_s20  ;;  %s445_s27 = sld [smem:[#allocation7 + $0x82]] }
  0x35   : > { %v264_v6 = vstv %s441_s29  ;;  %s849_s30 = sld [smem:[#allocation7 + $0x83]]  ;;  %v262_v7 = vmul.f32 %v453_v1, %v261_v4 }
  0x36   : > { %s451_s21 = sld [smem:[#allocation8 + $0x1]]  ;;  %v267_v10 = vstv %s442_s6  ;;  %v265_v12 = vmul.f32 %v454_v5, %v264_v6  ;;  %s314_s6 = scalar_lea.hbm %s894_s3, %s463_s22 }
  0x37   : > { %v257_v9 = vstv %s247_s10  ;;  %s447_s28 = sld [smem:[#allocation7 + $0x100]]  ;;  %v268_v17 = vmul.f32 %v455_v8, %v267_v10  ;;  %s315_s10 = sshll.u32 %s234_s1, 4  ;;  %s316_s10 = int_to_ptr.vmem [resolvable:$true] %s315_s10 }
  0x38   : > { %v260_v11 = vadd.f32 %v259_v3, %v257_v9  ;;  %v272_v13 = vstv %s443_s23  ;;  %s448_s4 = sld [smem:[#allocation7 + $0x101]]  ;;  %s317_s15 = sshll.u32 %s314_s6, 4  ;;  %s318_s15 = int_to_ptr.hbm [resolvable:$true] %s317_s15 }
  0x39   : > { %v273_v14 = vmul.f32 %v272_v13, %v250_v0  ;;  %v275_v15 = vstv %s444_s26  ;;  %s449_s8 = sld [smem:[#allocation7 + $0x102]]  ;;  %s302_s23 = scalar_lea.sflag [#allocation4], %s833_s18 }
  0x3a   : > { %v263_v16 = vadd.f32 %v262_v7, %v260_v11  ;;  %v278_v18 = vstv %s445_s27  ;;  %s450_s11 = sld [smem:[#allocation7 + $0x103]]  ;;  %v276_v19 = vmul.f32 %v453_v1, %v275_v15  ;;  %s625_s26 = sshra.s32 %s318_s15, 4  ;;  %s626_s26 = int_to_ptr.hbm [resolvable:$true] %s625_s26 }
  0x3b   : > { %s452_s19 = sld [smem:[#allocation8 + $0x2]]  ;;  %v281_v22 = vstv %s849_s30  ;;  %v279_v24 = vmul.f32 %v454_v5, %v278_v18  ;;  %s627_s27 = scalar_lea.hbm %s626_s26, 6 }
  0x3c   : > { %v266_v20 = vadd.f32 %v265_v12, %v263_v16  ;;  %v271_v21 = vstv %s451_s21  ;;  %v282_v30 = vmul.f32 %v455_v8, %v281_v22  ;;  %p628_p3 = scmp.ne.s32.totalorder %s626_s26, %s627_s27  ;;  %p632_p11 = scmp.lt.s32.totalorder %s626_s26, %s894_s3 }
  0x3d   : > { %v274_v23 = vadd.f32 %v273_v14, %v271_v21  ;;  %v287_v25 = vstv %s447_s28  ;;  %s631_s28 = scalar_lea.hbm %s894_s3, 12 }
  0x3e   : > { %v269_v26 = vadd.f32 %v268_v17, %v266_v20  ;;  %v288_v27 = vmul.f32 %v287_v25, %v250_v0  ;;  %v290_v28 = vstv %s448_s4  ;;  %p629_p7 = pnand %p628_p3, %p781_p8  ;;  %p633_p12 = scmp.lt.s32.totalorder %s631_s28, %s627_s27 }
  0x3f   : > { %v277_v29 = vadd.f32 %v276_v19, %v274_v23  ;;  %v293_v31 = vstv %s449_s8  ;;  %v291_v32 = vmul.f32 %v453_v1, %v290_v28 }
  0x40   : > { %270 = vst [vmem:[%s234_s1] sm:$0x3] %v269_v26  ;;  %v296_v35 = vstv %s450_s11  ;;  %v294_v37 = vmul.f32 %v454_v5, %v293_v31  ;;  %p630_p10 = pneg %p629_p7  ;;  %p634_p0 = por %p633_p12, %p632_p11 }
  0x41   : > { %v280_v33 = vadd.f32 %v279_v24, %v277_v29  ;;  %v286_v34 = vstv %s452_s19  ;;  %v297_v40 = vmul.f32 %v455_v8, %v296_v35 }
  0x42   : > { %v289_v36 = vadd.f32 %v288_v27, %v286_v34  ;;  %p635_p1 = pnand %p634_p0, %p630_p10 }
  0x43   : > { %v283_v38 = vadd.f32 %v282_v30, %v280_v33 }
  0x44   : > { %v292_v39 = vadd.f32 %v291_v32, %v289_v36 }
  0x45   : > { %456 = vst [vmem:[%s234_s1 + $0x2] sm:$0x3] %v283_v38 }
  0x46   : > { %v295_v41 = vadd.f32 %v294_v37, %v292_v39 }
  0x48   : > { %v298_v42 = vadd.f32 %v297_v40, %v295_v41 }
  0x4a   : > { %457 = vst [vmem:[%s234_s1 + $0x4] sm:$0x3] %v298_v42 }
  0x4b   : > { %638 = shalt.err (!%p635_p1)
}
  0x4c   : > { %s707_s18 = smov 32   ;;  %s708_s8 = smov 2  }
  0x4d   : > { %474 = dma.vmem_to_hbm [thread:$0]  (%p781_p8), %s316_s10, 96, %s318_s15, %s302_s23, %s707_s18, %s707_s18, %s708_s8  }
  0x4e PF: > { %s332_s11 = sand.u32 1, %s681_s12   ;;  %p488_p2 = pnand %p432_p13, %p785_p9 }
  0x4f   : > { %s333_s19 = scalar_lea.sflag [#allocation4], %s332_s11 }
  0x50   : > { %p489_p4 = pneg %p488_p2 }
  0x52   : > { %676 = dma.done.wait (%p489_p4), %s333_s19, 96  }
  0x53   : > { %678 = vsyncadd (%p489_p4), %s333_s19, 4294967200  ;;  %s21_s17 = sadd.s32 1, %s701_s17   ;;  %s904_s12 = smov %s685_s13 }
  0x54   : > { %p18_p6 = scmp.ge.s32.totalorder %s21_s17, 4   ;;  %s905_s13 = smov %s689_s14 }
  0x55   : > { %s906_s14 = smov %s826_s5  ;;  %s907_s15 = smov %s697_s16 }
  0x56   : > { %s908_s16 = smov %s910_s9  ;;  %20 = sbr.rel (!%p18_p6) target bundleno = 10 (0xa), region = 92 }
  0x5b   :  { %339 = vsyncpa [#allocation3], 1 }
  0x5c   :  { %341 = vsyncpa [#allocation3 + $0x1], 1 }
  0x5d   :  { %342 = vsyncpa [#allocation4], 1 }
  0x5e   :  { %344 = vsyncpa [#allocation4 + $0x1], 1 }
  0x5f   :  { %345 = vsyncpa [#allocation5], 1 }
  0x60   :  { %347 = vsyncpa [#allocation5 + $0x1], 1 }
  0x61   :  { %348 = vsyncpa [#allocation6], 1 }
  0x62   :  { %350 = vsyncpa [#allocation6 + $0x1], 1 }

</bundles_post_ra>
